<compile_context>
chip_gen: v5e
topology: v5e:2x2
jax: 0.10.0
libtpu: 0.0.40
codegen_flags: <defaults>
</compile_context>

<pallas_src>
import numpy as np
import jax
import jax.numpy as jnp
from jax.experimental import pallas as pl
from jax.experimental.pallas import tpu as pltpu

# ---------------- SSIM constants (match the reference module) ----------------
WIN_SIZE = 11
WIN_SIGMA = 1.5
K1, K2 = 0.01, 0.03
DATA_RANGE = 256.0  # the module calls ssim(..., data_range=256)
C1 = (K1 * DATA_RANGE) ** 2
C2 = (K2 * DATA_RANGE) ** 2

# Deterministic 1-D Gaussian window.
_coords = np.arange(WIN_SIZE, dtype=np.float64) - WIN_SIZE // 2
_g = np.exp(-(_coords ** 2) / (2.0 * WIN_SIGMA ** 2))
GAUSS_1D = (_g / _g.sum())


def _gauss_band(n: int, n_valid: int) -> np.ndarray:
    """Banded (Toeplitz-like) matrix G of shape (n, n) with
    G[j + k, j] = gauss[k] for j < n_valid, 0 <= k < WIN_SIZE, else 0.

    `img @ G` computes the VALID 1-D Gaussian convolution along the last axis
    into columns [0, n_valid); the remaining columns are exactly zero, which
    keeps all intermediates lane-dense (full width n)."""
    m = np.zeros((n, n), dtype=np.float64)
    for j in range(n_valid):
        for k in range(WIN_SIZE):
            m[j + k, j] = GAUSS_1D[k]
    return m.astype(np.float32)


def _ssim_plane_kernel(x_ref, y_ref, gh_ref, gw_ref, o_ref):
    """Process one (H, W) plane per grid step.

    x_ref, y_ref : (1, H, W) input plane tiles (native dtype, cast here).
    gh_ref       : (H, H) f32 banded Gaussian matrix (applied along H).
    gw_ref       : (W, W) f32 banded Gaussian matrix (applied along W).
    o_ref        : (1, 1, W) f32 partial sums of the masked SSIM map
                   (summed over rows; columns >= Wv are zero).
    """
    x = x_ref[0].astype(jnp.float32)   # (H, W)
    y = y_ref[0].astype(jnp.float32)   # (H, W)
    gh = gh_ref[...]                   # (H, H)
    gw = gw_ref[...]                   # (W, W)

    h, w = x.shape
    hv = h - WIN_SIZE + 1
    wv = w - WIN_SIZE + 1

    def filt(img):
        # Separable Gaussian VALID conv as two MXU matmuls:
        #   along W (lane axis):     img @ Gw   -> (H, W)
        #   along H (sublane axis):  Gh @ (...) -> (H, W)
        # Result is valid in [0:hv, 0:wv] and exactly zero elsewhere.
        t = jnp.dot(img, gw, preferred_element_type=jnp.float32)
        return jnp.dot(gh, t, preferred_element_type=jnp.float32)

    mu1 = filt(x)
    mu2 = filt(y)
    e_xx = filt(x * x)
    e_yy = filt(y * y)
    e_xy = filt(x * y)

    mu1_sq = mu1 * mu1
    mu2_sq = mu2 * mu2
    mu1_mu2 = mu1 * mu2
    sigma1_sq = e_xx - mu1_sq
    sigma2_sq = e_yy - mu2_sq
    sigma12 = e_xy - mu1_mu2

    # Fused SSIM map: one EUP approx reciprocal instead of two full divides.
    num = (2.0 * mu1_mu2 + C1) * (2.0 * sigma12 + C2)
    den = (mu1_sq + mu2_sq + C1) * (sigma1_sq + sigma2_sq + C2)
    ssim_map = num * pl.reciprocal(den, approx=True)

    # Mask the invalid (zero-filtered) border, reduce over rows (sublanes);
    # keep the 128-lane-wide row of per-column partial sums as output.
    row_idx = jax.lax.broadcasted_iota(jnp.int32, (h, w), 0)
    col_idx = jax.lax.broadcasted_iota(jnp.int32, (h, w), 1)
    valid = (row_idx < hv) & (col_idx < wv)
    masked = jnp.where(valid, ssim_map, 0.0)

    partial = jnp.sum(masked, axis=0, keepdims=True)           # (1, W)
    o_ref[...] = partial.reshape(1, 1, w)


def ssim_loss(y_pred, y_true):
    """y_pred, y_true: NCHW arrays. Returns scalar f32 loss = 1 - SSIM."""
    assert y_pred.shape == y_true.shape and y_pred.ndim == 4
    n, c, h, w = y_pred.shape
    assert h >= WIN_SIZE and w >= WIN_SIZE, "spatial dims must be >= win_size (11)"
    b = n * c
    hv = h - WIN_SIZE + 1
    wv = w - WIN_SIZE + 1

    # No dtype cast here: DMA the native dtype, cast inside the kernel.
    xb = y_pred.reshape(b, h, w)
    yb = y_true.reshape(b, h, w)

    gh = jnp.asarray(_gauss_band(h, hv).T)   # (H, H): Gh[i, i+k] = g[k], rows >= Hv are 0
    gw = jnp.asarray(_gauss_band(w, wv))     # (W, W): Gw[j+k, j] = g[k], cols >= Wv are 0

    partial = pl.pallas_call(
        _ssim_plane_kernel,
        out_shape=jax.ShapeDtypeStruct((b, 1, w), jnp.float32),
        grid=(b,),
        in_specs=[
            pl.BlockSpec((1, h, w), lambda i: (i, 0, 0)),
            pl.BlockSpec((1, h, w), lambda i: (i, 0, 0)),
            pl.BlockSpec((h, h), lambda i: (0, 0)),
            pl.BlockSpec((w, w), lambda i: (0, 0)),
        ],
        out_specs=pl.BlockSpec((1, 1, w), lambda i: (i, 0, 0)),
        compiler_params=pltpu.CompilerParams(
            dimension_semantics=("parallel",)),
    )(xb, yb, gh, gw)

    ssim_mean = jnp.sum(partial) / jnp.float32(b * hv * wv)
    return (1.0 - ssim_mean).astype(jnp.float32)


if __name__ == "__main__":
    key = jax.random.PRNGKey(0)
    k1, k2 = jax.random.split(key)
    N, C, H, W = 2, 4, 16, 16
    # Images in [0, 256) to match data_range=256.
    y_pred = jax.random.uniform(k1, (N, C, H, W), jnp.float32) * 256.0
    y_true = jax.random.uniform(k2, (N, C, H, W), jnp.float32) * 256.0

    loss = jax.block_until_ready(ssim_loss(y_pred, y_true))
    loss_same = jax.block_until_ready(ssim_loss(y_true, y_true))

    # Sanity: identical-image SSIM ~ 1 -> loss ~ 0 (approx reciprocal tolerance);
    # random pair must be finite and in the valid SSIM-loss range.
    assert np.isfinite(float(loss))
    assert abs(float(loss_same)) < 5e-3, f"identical-image loss = {float(loss_same)}"
    assert -1e-3 <= float(loss) <= 2.0 + 1e-3

    print("KERNEL_OK")
</pallas_src>

<mosaic_0001>
module attributes {stable_mosaic.version = 11 : i64} {
  func.func @_ssim_plane_kernel(%arg0: i32, %arg1: memref<1x16x16xf32, #tpu.memory_space<vmem>>, %arg2: memref<1x16x16xf32, #tpu.memory_space<vmem>>, %arg3: memref<16x16xf32, #tpu.memory_space<vmem>>, %arg4: memref<16x16xf32, #tpu.memory_space<vmem>>, %arg5: memref<1x1x16xf32, #tpu.memory_space<vmem>>) attributes {dimension_semantics = [#tpu.dimension_semantics<parallel>], iteration_bounds = array<i64: 8>, scalar_prefetch = 0 : i64, scratch_operands = 0 : i64, tpu.core_type = #tpu.core_type<tc>, window_params = [{transform_indices = @transform_0, window_bounds = array<i64: 1, 16, 16>}, {transform_indices = @transform_1, window_bounds = array<i64: 1, 16, 16>}, {pipeline_mode = #tpu.pipeline_mode<synchronous>, transform_indices = @transform_2, window_bounds = array<i64: 16, 16>}, {pipeline_mode = #tpu.pipeline_mode<synchronous>, transform_indices = @transform_3, window_bounds = array<i64: 16, 16>}, {transform_indices = @transform_4, window_bounds = array<i64: 1, 1, 16>}]} {
    %c0 = arith.constant 0 : index
    %c0_0 = arith.constant 0 : index
    %c0_1 = arith.constant 0 : index
    %0 = vector.load %arg1[%c0, %c0_0, %c0_1] : memref<1x16x16xf32, #tpu.memory_space<vmem>>, vector<1x16x16xf32>
    %1 = vector.shape_cast %0 : vector<1x16x16xf32> to vector<16x16xf32>
    %c0_2 = arith.constant 0 : index
    %c0_3 = arith.constant 0 : index
    %c0_4 = arith.constant 0 : index
    %2 = vector.load %arg2[%c0_2, %c0_3, %c0_4] : memref<1x16x16xf32, #tpu.memory_space<vmem>>, vector<1x16x16xf32>
    %3 = vector.shape_cast %2 : vector<1x16x16xf32> to vector<16x16xf32>
    %c0_5 = arith.constant 0 : index
    %c0_6 = arith.constant 0 : index
    %4 = vector.load %arg3[%c0_5, %c0_6] : memref<16x16xf32, #tpu.memory_space<vmem>>, vector<16x16xf32>
    %c0_7 = arith.constant 0 : index
    %c0_8 = arith.constant 0 : index
    %5 = vector.load %arg4[%c0_7, %c0_8] : memref<16x16xf32, #tpu.memory_space<vmem>>, vector<16x16xf32>
    %cst = arith.constant dense<0.000000e+00> : vector<16x16xf32>
    %6 = tpu.matmul %1, %5, %cst {dimension_numbers = #tpu.dot_dimension_numbers<[1], [0], [0], [1], [0, 0, 1, 1], [], []>} : vector<16x16xf32>, vector<16x16xf32>, vector<16x16xf32> -> vector<16x16xf32>
    %cst_9 = arith.constant dense<0.000000e+00> : vector<16x16xf32>
    %7 = tpu.matmul %4, %6, %cst_9 {dimension_numbers = #tpu.dot_dimension_numbers<[1], [0], [0], [1], [0, 0, 1, 1], [], []>} : vector<16x16xf32>, vector<16x16xf32>, vector<16x16xf32> -> vector<16x16xf32>
    %cst_10 = arith.constant dense<0.000000e+00> : vector<16x16xf32>
    %8 = tpu.matmul %3, %5, %cst_10 {dimension_numbers = #tpu.dot_dimension_numbers<[1], [0], [0], [1], [0, 0, 1, 1], [], []>} : vector<16x16xf32>, vector<16x16xf32>, vector<16x16xf32> -> vector<16x16xf32>
    %cst_11 = arith.constant dense<0.000000e+00> : vector<16x16xf32>
    %9 = tpu.matmul %4, %8, %cst_11 {dimension_numbers = #tpu.dot_dimension_numbers<[1], [0], [0], [1], [0, 0, 1, 1], [], []>} : vector<16x16xf32>, vector<16x16xf32>, vector<16x16xf32> -> vector<16x16xf32>
    %10 = arith.mulf %1, %1 : vector<16x16xf32>
    %cst_12 = arith.constant dense<0.000000e+00> : vector<16x16xf32>
    %11 = tpu.matmul %10, %5, %cst_12 {dimension_numbers = #tpu.dot_dimension_numbers<[1], [0], [0], [1], [0, 0, 1, 1], [], []>} : vector<16x16xf32>, vector<16x16xf32>, vector<16x16xf32> -> vector<16x16xf32>
    %cst_13 = arith.constant dense<0.000000e+00> : vector<16x16xf32>
    %12 = tpu.matmul %4, %11, %cst_13 {dimension_numbers = #tpu.dot_dimension_numbers<[1], [0], [0], [1], [0, 0, 1, 1], [], []>} : vector<16x16xf32>, vector<16x16xf32>, vector<16x16xf32> -> vector<16x16xf32>
    %13 = arith.mulf %3, %3 : vector<16x16xf32>
    %cst_14 = arith.constant dense<0.000000e+00> : vector<16x16xf32>
    %14 = tpu.matmul %13, %5, %cst_14 {dimension_numbers = #tpu.dot_dimension_numbers<[1], [0], [0], [1], [0, 0, 1, 1], [], []>} : vector<16x16xf32>, vector<16x16xf32>, vector<16x16xf32> -> vector<16x16xf32>
    %cst_15 = arith.constant dense<0.000000e+00> : vector<16x16xf32>
    %15 = tpu.matmul %4, %14, %cst_15 {dimension_numbers = #tpu.dot_dimension_numbers<[1], [0], [0], [1], [0, 0, 1, 1], [], []>} : vector<16x16xf32>, vector<16x16xf32>, vector<16x16xf32> -> vector<16x16xf32>
    %16 = arith.mulf %1, %3 : vector<16x16xf32>
    %cst_16 = arith.constant dense<0.000000e+00> : vector<16x16xf32>
    %17 = tpu.matmul %16, %5, %cst_16 {dimension_numbers = #tpu.dot_dimension_numbers<[1], [0], [0], [1], [0, 0, 1, 1], [], []>} : vector<16x16xf32>, vector<16x16xf32>, vector<16x16xf32> -> vector<16x16xf32>
    %cst_17 = arith.constant dense<0.000000e+00> : vector<16x16xf32>
    %18 = tpu.matmul %4, %17, %cst_17 {dimension_numbers = #tpu.dot_dimension_numbers<[1], [0], [0], [1], [0, 0, 1, 1], [], []>} : vector<16x16xf32>, vector<16x16xf32>, vector<16x16xf32> -> vector<16x16xf32>
    %19 = arith.mulf %7, %7 : vector<16x16xf32>
    %20 = arith.mulf %9, %9 : vector<16x16xf32>
    %21 = arith.mulf %7, %9 : vector<16x16xf32>
    %22 = arith.subf %12, %19 : vector<16x16xf32>
    %23 = arith.subf %15, %20 : vector<16x16xf32>
    %24 = arith.subf %18, %21 : vector<16x16xf32>
    %cst_18 = arith.constant 2.000000e+00 : f32
    %25 = vector.broadcast %cst_18 : f32 to vector<16x16xf32>
    %26 = arith.mulf %25, %21 : vector<16x16xf32>
    %cst_19 = arith.constant 6.553600e+00 : f32
    %27 = vector.broadcast %cst_19 : f32 to vector<16x16xf32>
    %28 = arith.addf %26, %27 : vector<16x16xf32>
    %cst_20 = arith.constant 2.000000e+00 : f32
    %29 = vector.broadcast %cst_20 : f32 to vector<16x16xf32>
    %30 = arith.mulf %29, %24 : vector<16x16xf32>
    %cst_21 = arith.constant 5.898240e+01 : f32
    %31 = vector.broadcast %cst_21 : f32 to vector<16x16xf32>
    %32 = arith.addf %30, %31 : vector<16x16xf32>
    %33 = arith.mulf %28, %32 : vector<16x16xf32>
    %34 = arith.addf %19, %20 : vector<16x16xf32>
    %cst_22 = arith.constant 6.553600e+00 : f32
    %35 = vector.broadcast %cst_22 : f32 to vector<16x16xf32>
    %36 = arith.addf %34, %35 : vector<16x16xf32>
    %37 = arith.addf %22, %23 : vector<16x16xf32>
    %cst_23 = arith.constant 5.898240e+01 : f32
    %38 = vector.broadcast %cst_23 : f32 to vector<16x16xf32>
    %39 = arith.addf %37, %38 : vector<16x16xf32>
    %40 = arith.mulf %36, %39 : vector<16x16xf32>
    %41 = tpu.reciprocal %40 {approx = true} : vector<16x16xf32> -> vector<16x16xf32>
    %42 = arith.mulf %33, %41 : vector<16x16xf32>
    %43 = tpu.iota {dimensions = array<i32: 0>} : vector<16x16xi32>
    %44 = tpu.iota {dimensions = array<i32: 1>} : vector<16x16xi32>
    %c6_i32 = arith.constant 6 : i32
    %45 = vector.broadcast %c6_i32 : i32 to vector<16x16xi32>
    %46 = arith.cmpi slt, %43, %45 : vector<16x16xi32>
    %c6_i32_24 = arith.constant 6 : i32
    %47 = vector.broadcast %c6_i32_24 : i32 to vector<16x16xi32>
    %48 = arith.cmpi slt, %44, %47 : vector<16x16xi32>
    %49 = arith.andi %46, %48 : vector<16x16xi1>
    %cst_25 = arith.constant 0.000000e+00 : f32
    %50 = vector.broadcast %cst_25 : f32 to vector<16x16xf32>
    %51 = arith.select %49, %42, %50 : vector<16x16xi1>, vector<16x16xf32>
    %cst_26 = arith.constant dense<0.000000e+00> : vector<16xf32>
    %52 = vector.multi_reduction <add>, %51, %cst_26 [0] : vector<16x16xf32> to vector<16xf32>
    %53 = vector.shape_cast %52 : vector<16xf32> to vector<1x16xf32>
    %54 = vector.shape_cast %53 : vector<1x16xf32> to vector<1x1x16xf32>
    %c0_27 = arith.constant 0 : index
    %c0_28 = arith.constant 0 : index
    %c0_29 = arith.constant 0 : index
    %55 = vector.load %arg5[%c0_27, %c0_28, %c0_29] : memref<1x1x16xf32, #tpu.memory_space<vmem>>, vector<1x1x16xf32>
    tpu.vector_store %arg5[%c0_27, %c0_28, %c0_29], %54 {strides = array<i32>} : memref<1x1x16xf32, #tpu.memory_space<vmem>>, vector<1x1x16xf32>,
    return
  }
  func.func @transform_0(%arg0: i32) -> (i32, i32, i32) {
    %c0_i32 = arith.constant 0 : i32
    %c0_i32_0 = arith.constant 0 : i32
    %c0_i32_1 = arith.constant 0 : i32
    return %arg0, %c0_i32, %c0_i32_0 : i32, i32, i32
  }
  func.func @transform_1(%arg0: i32) -> (i32, i32, i32) {
    %c0_i32 = arith.constant 0 : i32
    %c0_i32_0 = arith.constant 0 : i32
    %c0_i32_1 = arith.constant 0 : i32
    return %arg0, %c0_i32, %c0_i32_0 : i32, i32, i32
  }
  func.func @transform_2(%arg0: i32) -> (i32, i32) {
    %c0_i32 = arith.constant 0 : i32
    %c0_i32_0 = arith.constant 0 : i32
    %c0_i32_1 = arith.constant 0 : i32
    return %c0_i32, %c0_i32_0 : i32, i32
  }
  func.func @transform_3(%arg0: i32) -> (i32, i32) {
    %c0_i32 = arith.constant 0 : i32
    %c0_i32_0 = arith.constant 0 : i32
    %c0_i32_1 = arith.constant 0 : i32
    return %c0_i32, %c0_i32_0 : i32, i32
  }
  func.func @transform_4(%arg0: i32) -> (i32, i32, i32) {
    %c0_i32 = arith.constant 0 : i32
    %c0_i32_0 = arith.constant 0 : i32
    %c0_i32_1 = arith.constant 0 : i32
    return %arg0, %c0_i32, %c0_i32_0 : i32, i32, i32
  }
}

</mosaic_0001>

<bundles_post_ra>
// kernel: tpu_custom_call.1
= control target key start
LH: loop header
LB: loop body
LE: loop exit
PB: predicated region body
PF: predicated region fallthrough
CT: control target
= control target key end

     0   :  { %s1310_s0 = inlined_call_operand.hbm [shape: f32[8,16,16], index: 0, kind: input, shape index: {}]   ;;  %s1311_s1 = inlined_call_operand.hbm [shape: f32[8,16,16], index: 1, kind: input, shape index: {}]   ;;  %s1312_s2 = inlined_call_operand.hbm [shape: f32[16,16], index: 2, kind: input, shape index: {}]   ;;  %s1313_s3 = inlined_call_operand.hbm [shape: f32[16,16], index: 3, kind: input, shape index: {}]   ;;  %s1314_s4 = inlined_call_operand.hbm [shape: f32[8,1,16], index: 4, kind: output, shape index: {}]  }
   0x1   :  { %1319 = sst [smem:[#allocation16_spill]] %s1310_s0 }
   0x2   :  { %1320 = sst [smem:[#allocation17_spill]] %s1312_s2 }
   0x3   :  { %1321 = sst [smem:[#allocation18_spill]] %s1313_s3 }
   0x4   :  { %9 = vsyncpa [#allocation3], 0 }
   0x5   :  { %11 = vsyncpa [#allocation3 + $0x1], 0 }
   0x6   :  { %12 = vsyncpa [#allocation6], 0 }
   0x7   :  { %14 = vsyncpa [#allocation6 + $0x1], 0 }
   0x8   :  { %15 = vsyncpa [#allocation9], 0 }
   0x9   :  { %16 = vsyncpa [#allocation4], 0 }
   0xa   :  { %18 = vsyncpa [#allocation4 + $0x1], 0  ;;  %s1102_s15 = smov 0   ;;  %s1104_s16 = smov 0  }
   0xb   :  { %s1106_s17 = smov 0   ;;  %s1108_s18 = smov 0  }
   0xc LB: > { %s1123_s19 = sadd.s32 4294967295, %s1071_s18   ;;  %s753_s20 = sadd.s32 4294967294, %s1071_s18   ;;  %s1071_s18 = sphi %s1108_s18, %s1335_s18   ;;  %s1067_s17 = sphi %s1106_s17, %s1334_s17   ;;  %s1063_s16 = sphi %s1104_s16, %s1333_s16   ;;  %s1059_s15 = sphi %s1102_s15, %s1332_s15  }
   0xd   : > { %p44_p0 = scmp.ne.s32.totalorder %s1063_s16, %s1059_s15  ;;  %p45_p1 = scmp.eq.s32.totalorder %s1123_s19, 0 }
   0xe   : > { %p136_p2 = scmp.eq.s32.totalorder %s1123_s19, 7  ;;  %p142_p3 = scmp.eq.s32.totalorder %s753_s20, 7 }
   0xf   : > { %p1132_p4 = por %p45_p1, %p44_p0  ;;  %p754_p5 = scmp.ge.s32.totalorder %s1071_s18, 1 }
  0x10   : > { %p1137_p6 = por %p142_p3, %p44_p0  ;;  %p149_p7 = scmp.lt.s32.totalorder %s1071_s18, 9 }
  0x11   : > { %s1324_s2 = sld [smem:[#allocation17_spill]]  ;;  %s1073_s27 = smov [#allocation7]  }
  0x12   : > { %p1145_p8 = pnand %p754_p5, %p149_p7  ;;  %s162_s28 = sshll.u32 %s1073_s27, 4  ;;  %s163_s28 = int_to_ptr.vmem [resolvable:$true] %s162_s28 }
  0x13   : > { %s1326_s3 = sld [smem:[#allocation18_spill]]  ;;  %s1315_s6 = smov 128  }
  0x14   : > { %p811_p9 = pneg %p1145_p8  ;;  %s1317_s7 = smov 8  }
  0x15   : > { %s1076_s8 = smov [#allocation8]   ;;  %s1163_s10 = sadd.s32 1, %s1071_s18  }
  0x16   : > { %p812_p10 = pnand %p811_p9, %p45_p1  ;;  %s176_s9 = sshll.u32 %s1076_s8, 4  ;;  %s177_s9 = int_to_ptr.vmem [resolvable:$true] %s176_s9 }
  0x17   : > { %s160_s25 = sshll.u32 %s1324_s2, 4  ;;  %s31_s11 = sadd.s32 1, %s1067_s17  ;;  %s161_s25 = int_to_ptr.hbm [resolvable:$true] %s160_s25 }
  0x18   : > { %814 = dma.hbm_to_vmem [thread:$0]  (!%p812_p10), %s161_s25, 256, %s163_s28, [#allocation6], %s1315_s6, %s1315_s6, %s1317_s7  }
  0x19   : > { %s174_s5 = sshll.u32 %s1326_s3, 4  ;;  %s28_s12 = ssub.s32 %s1071_s18, %s1163_s10  ;;  %s175_s5 = int_to_ptr.hbm [resolvable:$true] %s174_s5 }
  0x1a   : > { %817 = dma.hbm_to_vmem [thread:$0]  (!%p812_p10), %s175_s5, 256, %s177_s9, [#allocation9], %s1315_s6, %s1315_s6, %s1317_s7  }
  0x1b   : > { %p38_p11 = scmp.ne.s32.totalorder %s1067_s17, %s1063_s16  ;;  %p29_p12 = scmp.eq.s32.totalorder %s28_s12, 0 }
  0x1c   : > { %p39_p13 = scmp.eq.s32.totalorder %s1071_s18, 0  ;;  %p831_p3 = scmp.lt.s32.totalorder %s1071_s18, 8 }
  0x1d   : > { %p1173_p0 = por %p136_p2, %p38_p11  ;;  %s190_s20 = sand.u32 1, %s1067_s17  }
  0x1e   : > { %s1179_s14 = scalar_select %p29_p12, %s1067_s17, %s31_s11  }
  0x1f   : > { %p40_p5 = por %p39_p13, %p38_p11  ;;  %s1182_s23 = sshll.u32 %s190_s20, 4 }
  0x20   : > { %s791_s24 = sshll.u32 %s1071_s18, 4  ;;  %s1328_s0 = sld [smem:[#allocation16_spill]] }
  0x21   : > { %s194_s29 = scalar_lea.vmem [#allocation2], %s1182_s23  ;;  %p1189_p2 = pnand %p831_p3, %p40_p5 }
  0x22   : > { %s202_s30 = sshll.u32 %s194_s29, 4  ;;  %s221_s12 = scalar_lea.hbm %s1311_s1, %s791_s24  ;;  %s203_s30 = int_to_ptr.vmem [resolvable:$true] %s202_s30 }
  0x23   : > { %s222_s6 = sshll.u32 %s221_s12, 4  ;;  %s191_s7 = scalar_lea.sflag [#allocation3], %s190_s20  ;;  %s223_s6 = int_to_ptr.hbm [resolvable:$true] %s222_s6 }
  0x24   : > { %p937_p9 = pneg %p1189_p2 }
  0x26   : > { %s199_s28 = scalar_lea.hbm %s1328_s0, %s791_s24  ;;  %s940_s29 = scalar_lea.hbm %s1328_s0, 128 }
  0x27   : > { %s200_s5 = sshll.u32 %s199_s28, 4  ;;  %s201_s5 = int_to_ptr.hbm [resolvable:$true] %s200_s5 }
  0x28   : > { %s933_s2 = sshra.s32 %s201_s5, 4  ;;  %s934_s2 = int_to_ptr.hbm [resolvable:$true] %s933_s2 }
  0x29   : > { %s935_s25 = scalar_lea.hbm %s934_s2, 16  ;;  %p941_p12 = scmp.lt.s32.totalorder %s934_s2, %s1328_s0 }
  0x2a   : > { %p936_p7 = scmp.ne.s32.totalorder %s934_s2, %s935_s25  ;;  %p942_p13 = scmp.lt.s32.totalorder %s940_s29, %s935_s25 }
  0x2c   : > { %p938_p10 = pnand %p937_p9, %p936_p7  ;;  %p943_p3 = por %p942_p13, %p941_p12 }
  0x2e   : > { %p939_p11 = pneg %p938_p10 }
  0x30   : > { %p944_p5 = pnand %p943_p3, %p939_p11 }
  0x32   : > { %947 = shalt.err (!%p944_p5)
}
  0x33   : > { %s1330_s20 = smov 8   ;;  %s1331_s24 = smov 128  }
  0x34   : > { %821 = dma.hbm_to_vmem [thread:$0]  (!%p1189_p2), %s201_s5, 256, %s203_s30, %s191_s7, %s1331_s24, %s1331_s24, %s1330_s20  }
  0x35   : > { %s216_s12 = scalar_lea.vmem [#allocation5], %s1182_s23  ;;  %s212_s28 = sand.u32 1, %s1071_s18  }
  0x36   : > { %s224_s27 = sshll.u32 %s216_s12, 4  ;;  %s213_s9 = scalar_lea.sflag [#allocation6], %s212_s28  ;;  %s225_s27 = int_to_ptr.vmem [resolvable:$true] %s224_s27 }
  0x37   : > { %s963_s2 = sshra.s32 %s223_s6, 4  ;;  %s970_s0 = scalar_lea.hbm %s1311_s1, 128  ;;  %s964_s2 = int_to_ptr.hbm [resolvable:$true] %s963_s2 }
  0x38   : > { %s965_s25 = scalar_lea.hbm %s964_s2, 16  ;;  %p971_p12 = scmp.lt.s32.totalorder %s964_s2, %s1311_s1 }
  0x39   : > { %p966_p7 = scmp.ne.s32.totalorder %s964_s2, %s965_s25  ;;  %p972_p13 = scmp.lt.s32.totalorder %s970_s0, %s965_s25 }
  0x3b   : > { %p968_p10 = pnand %p966_p7, %p937_p9  ;;  %p973_p3 = por %p972_p13, %p971_p12 }
  0x3d   : > { %p969_p11 = pneg %p968_p10 }
  0x3f   : > { %p974_p5 = pnand %p973_p3, %p969_p11 }
  0x41   : > { %977 = shalt.err (!%p974_p5)
}
  0x42   : > { %824 = dma.hbm_to_vmem [thread:$0]  (!%p1189_p2), %s223_s6, 256, %s225_s27, %s213_s9, %s1331_s24, %s1331_s24, %s1330_s20  }
  0x43   : > { %236 = sbr.rel (%p1145_p8) target bundleno = 417 (0x1a1), region = 36  ;;  %s1231_s23 = sand.u32 (!%p1145_p8), 1, %s1063_s16  }
  0x44   : > { %s765_s3 = sshll.u32 (!%p1145_p8), %s1231_s23, 4  ;;  %s239_s0 = scalar_lea.sflag (!%p1145_p8), [#allocation3], %s1231_s23 }
  0x45   : > { %s242_s30 = scalar_lea.vmem (!%p1145_p8), [#allocation2], %s765_s3 }
  0x48   : > { %1038 = dma.done.wait (%p1132_p4), %s239_s0, 256  }
  0x49   : > { %1040 = vsyncadd (%p1132_p4), %s239_s0, 4294967040  ;;  %s248_s6 = sand.u32 1, %s1123_s19   ;;  %s1240_s26 = scalar_lea.vmem [#allocation5], %s765_s3 }
  0x4a   : > { %s249_s5 = scalar_lea.sflag [#allocation6], %s248_s6 }
  0x4b   : > { %1042 = dma.done.wait (%p1132_p4), %s249_s5, 256  }
  0x4c   : > { %1044 = vsyncadd (%p1132_p4), %s249_s5, 4294967040 }
  0x4d   : > { %1046 = dma.done.wait (%p45_p1), [#allocation6], 256  }
  0x4e   : > { %1048 = vsyncadd (%p45_p1), [#allocation6], 4294967040 }
  0x4f   : > { %1050 = dma.done.wait (%p45_p1), [#allocation9], 256  }
  0x50   : > { %1052 = vsyncadd (%p45_p1), [#allocation9], 4294967040  ;;  %v299_v0 = vld [vmem:[#allocation8 + $0x8] sm:$0xff]  ;;  %v298_v1 = vld [vmem:[#allocation8] sm:$0xff]  ;;  %vm300_vm0 = vcmask 130048   ;;  %v609_v41 = vlaneseq  ;;  %s641_s20 = scalar_lea.hbm %s1314_s4, %s1123_s19  ;;  %s291_s24 = scalar_lea.vmem [#allocation10], %s1231_s23 }
  0x51   : > { %793 = vmatpush.msra.mxu2 %v299_v0  ;;  %v293_v2 = vld [vmem:[%s242_s30 + $0x8] sm:$0xff]  ;;  %321 = vmatpush.msra.mxu0 %v299_v0  ;;  %v292_v3 = vld [vmem:[%s242_s30] sm:$0xff]  ;;  %s643_s12 = sshll.u32 %s291_s24, 4  ;;  %s645_s27 = sshll.u32 %s641_s20, 4  ;;  %vm630_vm4 = vcmask 122880   ;;  %s644_s12 = int_to_ptr.vmem [resolvable:$true] %s643_s12  ;;  %s646_s27 = int_to_ptr.hbm [resolvable:$true] %s645_s27 }
  0x52   : > { %v411_v4 = vmul.f32 %v292_v3, %v292_v3  ;;  %v294_v5 = vld [vmem:[%s1240_s26] sm:$0xff]  ;;  %v412_v6 = vmul.f32 %v293_v2, %v293_v2  ;;  %v295_v7 = vld [vmem:[%s1240_s26 + $0x8] sm:$0xff]  ;;  %v610_v47 = vshrl.u32 %v609_v41, 7  ;;  %v613_v48 = vand.u32 127, %v609_v41  ;;  %s633_s28 = scalar_lea.sflag [#allocation4], %s1231_s23  ;;  %s1007_s9 = sshra.s32 %s646_s27, 4  ;;  %s1008_s9 = int_to_ptr.hbm [resolvable:$true] %s1007_s9 }
  0x53   : > { %794 = vmatpush.msra.mxu2 %v298_v1  ;;  %322 = vmatpush.msra.mxu0 %v298_v1  ;;  %v465_v8 = vmul.f32 %v294_v5, %v294_v5  ;;  %v519_v9 = vmul.f32 %v294_v5, %v292_v3  ;;  %v466_v10 = vmul.f32 %v295_v7, %v295_v7  ;;  %v297_v14 = vld [vmem:[#allocation7 + $0x8] sm:$0xff]  ;;  %v296_v15 = vld [vmem:[#allocation7] sm:$0xff]  ;;  %s1009_s2 = scalar_lea.hbm %s1008_s9, 1  ;;  %s1013_s29 = scalar_lea.hbm %s1314_s4, 8 }
  0x54   : > { %770 = vmatmul.msk.f32.vlgmr.msra.gmra.mxu2 %vm300_vm0, %v293_v2  ;;  %769 = vmatmul.msk.f32.vlgmr.msra.gmra.mxu0 %vm300_vm0, %v292_v3  ;;  %v520_v11 = vmul.f32 %v295_v7, %v293_v2  ;;  %vm614_vm1 = vcmp.lt.s32.totalorder %v610_v47, 6  ;;  %vm616_vm2 = vcmp.lt.s32.totalorder %v613_v48, 6  ;;  %p1010_p1 = scmp.ne.s32.totalorder %s1008_s9, %s1009_s2  ;;  %p1014_p2 = scmp.lt.s32.totalorder %s1008_s9, %s1314_s4 }
  0x55   : > { %379 = vmatpush.msrb.mxu2 %v299_v0  ;;  %433 = vmatpush.msrb.mxu0 %v299_v0  ;;  %vm617_vm3 = vmand %vm614_vm1, %vm616_vm2  ;;  %p1015_p9 = scmp.lt.s32.totalorder %s1013_s29, %s1009_s2 }
  0x56   : > { %p1011_p4 = pnand %p1010_p1, %p1173_p0 }
  0x57   : > { %380 = vmatpush.msrb.mxu2 %v298_v1  ;;  %434 = vmatpush.msrb.mxu0 %v298_v1  ;;  %p1016_p7 = por %p1015_p9, %p1014_p2 }
  0x58   : > { %p1012_p8 = pneg %p1011_p4 }
  0x59   : > { %487 = vmatpush.msra.mxu2 %v299_v0  ;;  %541 = vmatpush.msra.mxu0 %v299_v0 }
  0x5a   : > { %p1017_p10 = pnand %p1016_p7, %p1012_p8 }
  0x5b   : > { %488 = vmatpush.msra.mxu2 %v298_v1  ;;  %542 = vmatpush.msra.mxu0 %v298_v1 }
  0x5c   : > { %773 = vmatmul.msk.f32.vlgmr.msrb.gmra.mxu2 %vm300_vm0, %v294_v5  ;;  %777 = vmatmul.msk.f32.vlgmr.msrb.gmra.mxu0 %vm300_vm0, %v411_v4 }
  0x64   : > { %774 = vmatmul.msk.f32.gmra.mxu2 %vm300_vm0, %v295_v7  ;;  %778 = vmatmul.msk.f32.gmra.mxu0 %vm300_vm0, %v412_v6 }
  0x6c   : > { %781 = vmatmul.msk.f32.vlgmr.msra.gmra.mxu2 %vm300_vm0, %v465_v8  ;;  %785 = vmatmul.msk.f32.vlgmr.msra.gmra.mxu0 %vm300_vm0, %v519_v9 }
  0x74   : > { %782 = vmatmul.msk.f32.gmra.mxu2 %vm300_vm0, %v466_v10  ;;  %786 = vmatmul.msk.f32.gmra.mxu0 %vm300_vm0, %v520_v11 }
  0xd1   : > { %v324_v12 = vpop.f32.mrf.mxu0 }
  0xd7   : > { %v327_v13 = vpop.f32.mrf.mxu2 }
  0xd8   : > { %350 = vmatpush.msra.mxu1 %v327_v13  ;;  %795 = vmatpush.msra.mxu3 %v327_v13 }
  0xd9   : > { %v436_v16 = vpop.f32.mrf.mxu0 }
  0xda   : > { %796 = vmatpush.msra.mxu3 %v324_v12  ;;  %351 = vmatpush.msra.mxu1 %v324_v12 }
  0xdb   : > { %772 = vmatmul.msk.f32.vlgmr.msra.gmra.mxu3 %vm300_vm0, %v297_v14  ;;  %771 = vmatmul.msk.f32.vlgmr.msra.gmra.mxu1 %vm300_vm0, %v296_v15 }
  0xdf   : > { %v382_v17 = vpop.f32.mrf.mxu2 }
  0xe1   : > { %v439_v18 = vpop.f32.mrf.mxu0 }
  0xe2   : > { %456 = vmatpush.msrb.mxu1 %v439_v18 }
  0xe4   : > { %457 = vmatpush.msrb.mxu1 %v436_v16 }
  0xe5   : > { %779 = vmatmul.msk.f32.vlgmr.msrb.gmra.mxu1 %vm300_vm0, %v296_v15 }
  0xe7   : > { %v385_v19 = vpop.f32.mrf.mxu2 }
  0xe8   : > { %402 = vmatpush.msrb.mxu3 %v385_v19 }
  0xe9   : > { %v544_v20 = vpop.f32.mrf.mxu0 }
  0xea   : > { %403 = vmatpush.msrb.mxu3 %v382_v17 }
  0xeb   : > { %775 = vmatmul.msk.f32.vlgmr.msrb.gmra.mxu3 %vm300_vm0, %v296_v15 }
  0xed   : > { %780 = vmatmul.msk.f32.gmra.mxu1 %vm300_vm0, %v297_v14 }
  0xef   : > { %v490_v21 = vpop.f32.mrf.mxu2 }
  0xf1   : > { %v547_v22 = vpop.f32.mrf.mxu0 }
  0xf2   : > { %564 = vmatpush.msra.mxu1 %v547_v22 }
  0xf3   : > { %776 = vmatmul.msk.f32.gmra.mxu3 %vm300_vm0, %v297_v14 }
  0xf4   : > { %565 = vmatpush.msra.mxu1 %v544_v20 }
  0xf5   : > { %787 = vmatmul.msk.f32.vlgmr.msra.gmra.mxu1 %vm300_vm0, %v296_v15 }
  0xf7   : > { %v493_v23 = vpop.f32.mrf.mxu2 }
  0xf8   : > { %510 = vmatpush.msra.mxu3 %v493_v23 }
  0xfa   : > { %511 = vmatpush.msra.mxu3 %v490_v21 }
  0xfb   : > { %783 = vmatmul.msk.f32.vlgmr.msra.gmra.mxu3 %vm300_vm0, %v296_v15 }
  0xfd   : > { %788 = vmatmul.msk.f32.gmra.mxu1 %vm300_vm0, %v297_v14 }
 0x103   : > { %784 = vmatmul.msk.f32.gmra.mxu3 %vm300_vm0, %v297_v14 }
 0x158   : > { %v353_v24 = vpop.f32.mrf.mxu1 }
 0x159   : > { %v573_v32 = vmul.f32 %v353_v24, %v353_v24 }
 0x15e   : > { %v356_v25 = vpop.f32.mrf.mxu3 }
 0x162   : > { %v459_v26 = vpop.f32.mrf.mxu1 }
 0x163   : > { %v579_v36 = vsub.f32 %v459_v26, %v573_v32 }
 0x16a   : > { %v462_v27 = vpop.f32.mrf.mxu1 }
 0x16e   : > { %v405_v28 = vpop.f32.mrf.mxu3 }
 0x16f   : > { %v575_v33 = vmul.f32 %v405_v28, %v405_v28  ;;  %v577_v34 = vmul.f32 %v405_v28, %v353_v24 }
 0x171   : > { %v595_v37 = vadd.f32 %v575_v33, %v573_v32  ;;  %v585_v46 = vmul.f32 2.0, %v577_v34 }
 0x172   : > { %v567_v29 = vpop.f32.mrf.mxu1 }
 0x173   : > { %v583_v39 = vsub.f32 %v567_v29, %v577_v34  ;;  %v597_v42 = vadd.f32 6.5536, %v595_v37  ;;  %v587_v51 = vadd.f32 6.5536, %v585_v46 }
 0x175   : > { %v589_v44 = vmul.f32 2.0, %v583_v39 }
 0x176   : > { %v408_v30 = vpop.f32.mrf.mxu3 }
 0x177   : > { %v591_v50 = vadd.f32 58.9824, %v589_v44 }
 0x179   : > { %v593_v52 = vmul.f32 %v591_v50, %v587_v51 }
 0x17a   : > { %v570_v31 = vpop.f32.mrf.mxu1 }
 0x17e   : > { %v513_v35 = vpop.f32.mrf.mxu3 }
 0x17f   : > { %v581_v38 = vsub.f32 %v513_v35, %v575_v33 }
 0x181   : > { %v599_v40 = vadd.f32 %v581_v38, %v579_v36 }
 0x183   : > { %v601_v43 = vadd.f32 58.9824, %v599_v40 }
 0x185   : > { %v603_v45 = vmul.f32 %v601_v43, %v597_v42 }
 0x186   : > { %v516_v49 = vpop.f32.mrf.mxu3 }
 0x187   : > { %871 = vrcp.f32 %v603_v45 }
 0x18d   : > { %v872_v53 = vpop.eup %871 }
 0x18e   : > { %v607_v54 = vmul.f32 %v872_v53, %v593_v52 }
 0x190   : > { %v619_v55 = vsel %vm617_vm3, %v607_v54, 0.0 }
 0x191   : > { %v621_v56 = vsel %vm300_vm0, %v619_v55, 0.0 }
 0x192   : > { %v624_v57 = vrot.slane %v621_v56, 4 }
 0x194   : > { %v625_v58 = vadd.f32 %v624_v57, %v621_v56 }
 0x196   : > { %v626_v59 = vrot.slane %v625_v58, 2 }
 0x198   : > { %v627_v60 = vadd.f32 %v626_v59, %v625_v58 }
 0x19a   : > { %v628_v61 = vrot.slane %v627_v60, 1 }
 0x19c   : > { %v629_v62 = vadd.f32 %v628_v61, %v627_v60 }
 0x19e   : > { %631 = vst.msk [vmem:[%s291_s24] sm:$0x1] %vm630_vm4, %v629_v62 }
 0x19f   : > { %1020 = shalt.err (!%p1017_p10)
}
 0x1a0   : > { %809 = dma.vmem_to_hbm [thread:$0]  (%p1173_p0), %s644_s12, 16, %s646_s27, %s633_s28  }
 0x1a1 PF: > { %p834_p11 = scmp.ge.s32.totalorder %s1071_s18, 2  ;;  %s657_s23 = sand.u32 1, %s1059_s15  }
 0x1a2   : > { %s658_s3 = scalar_lea.sflag [#allocation4], %s657_s23 }
 0x1a3   : > { %p826_p12 = pnand %p834_p11, %p1137_p6 }
 0x1a5   : > { %p827_p13 = pneg %p826_p12 }
 0x1a7   : > { %1054 = dma.done.wait (%p827_p13), %s658_s3, 16  }
 0x1a8   : > { %1056 = vsyncadd (%p827_p13), %s658_s3, 4294967280  ;;  %p21_p3 = scmp.ge.s32.totalorder %s1163_s10, 10   ;;  %s1332_s15 = smov %s1063_s16 }
 0x1a9   : > { %s1333_s16 = smov %s1067_s17  ;;  %s1334_s17 = smov %s1179_s14 }
 0x1aa   : > { %s1335_s18 = smov %s1163_s10  ;;  %23 = sbr.rel (!%p21_p3) target bundleno = 12 (0xc), region = 102 }
 0x1af   :  { %663 = vsyncpa [#allocation3], 1 }
 0x1b0   :  { %665 = vsyncpa [#allocation3 + $0x1], 1 }
 0x1b1   :  { %666 = vsyncpa [#allocation6], 1 }
 0x1b2   :  { %668 = vsyncpa [#allocation6 + $0x1], 1 }
 0x1b3   :  { %669 = vsyncpa [#allocation9], 1 }
 0x1b4   :  { %670 = vsyncpa [#allocation4], 1 }
 0x1b5   :  { %672 = vsyncpa [#allocation4 + $0x1], 1 }

</bundles_post_ra>
